<compile_context>
chip_gen: v6e
topology: v6e:2x2x1
jax: 0.10.0
libtpu: 0.0.40
codegen_flags: <defaults>
</compile_context>

<pallas_src>
import jax
import jax.numpy as jnp
from jax.experimental import pallas as pl
from jax.experimental.pallas import tpu as pltpu


LN_EPS = 1e-5   # nn.LayerNorm default


def _round_up(n, m):
    return ((n + m - 1) // m) * m


def _ln_no_affine(h):
    """LayerNorm without affine (gamma/beta folded into the next Linear).
    One-pass E[h^2] - mean^2 with a non-negativity clamp before rsqrt."""
    mean = jnp.mean(h, axis=-1, keepdims=True)
    mean_sq = jnp.mean(h * h, axis=-1, keepdims=True)
    var = jnp.maximum(mean_sq - mean * mean, 0.0)
    return (h - mean) * jax.lax.rsqrt(var + LN_EPS)


def adultnet_kernel(x_ref,
                    w1_ref, b1_ref,
                    w2_ref, b2_ref,
                    w3_ref, b3_ref,
                    wo_ref, bo_ref,
                    out_ref):
    # x tile: (tile_b, input_dim) f32. Padded batch rows (if any) are all-zero;
    # with var clamped to 0 they normalize to 0 and produce finite logits.
    x = x_ref[...].astype(jnp.float32)

    def linear(h, w_ref, b_ref):
        # bf16 operands on the MXU, f32 accumulation, f32 bias add.
        return jnp.dot(h.astype(jnp.bfloat16), w_ref[...],
                       preferred_element_type=jnp.float32) + b_ref[...]

    # input_norm (affine folded into fc1)
    h = _ln_no_affine(x)
    # fc1 -> relu -> norm1   (dropout1 = identity; norm1 affine folded into fc2)
    h = _ln_no_affine(jnp.maximum(linear(h, w1_ref, b1_ref), 0.0))
    # fc2 -> relu -> norm2   (dropout2 = identity; norm2 affine folded into fc3)
    h = _ln_no_affine(jnp.maximum(linear(h, w2_ref, b2_ref), 0.0))
    # fc3 -> relu -> norm3   (dropout3 = identity; norm3 affine folded into fc_out)
    h = _ln_no_affine(jnp.maximum(linear(h, w3_ref, b3_ref), 0.0))
    # fc_out: true 2-wide logits, stored directly (no lane padding).
    out_ref[...] = linear(h, wo_ref, bo_ref).astype(out_ref.dtype)


def init_params(key, input_dim):
    """Deterministic init mirroring the PyTorch module:
       Linear weights ~ kaiming_normal_(relu) => N(0, sqrt(2/fan_in)), biases 0.
       LayerNorm gamma=1, beta=0.
       Weights are stored transposed: [in_features, out_features]."""
    dims = [(input_dim, 256), (256, 128), (128, 64), (64, 2)]
    keys = jax.random.split(key, len(dims))
    p = {}

    def kaiming(k, fan_in, fan_out):
        std = (2.0 / fan_in) ** 0.5
        return std * jax.random.normal(k, (fan_in, fan_out), dtype=jnp.float32)

    p["g0"] = jnp.ones((1, input_dim), jnp.float32)
    p["b0"] = jnp.zeros((1, input_dim), jnp.float32)
    p["g1"] = jnp.ones((1, 256), jnp.float32)
    p["bt1"] = jnp.zeros((1, 256), jnp.float32)
    p["g2"] = jnp.ones((1, 128), jnp.float32)
    p["bt2"] = jnp.zeros((1, 128), jnp.float32)
    p["g3"] = jnp.ones((1, 64), jnp.float32)
    p["bt3"] = jnp.zeros((1, 64), jnp.float32)

    p["w1"] = kaiming(keys[0], input_dim, 256)
    p["bb1"] = jnp.zeros((1, 256), jnp.float32)
    p["w2"] = kaiming(keys[1], 256, 128)
    p["bb2"] = jnp.zeros((1, 128), jnp.float32)
    p["w3"] = kaiming(keys[2], 128, 64)
    p["bb3"] = jnp.zeros((1, 64), jnp.float32)
    p["wo"] = kaiming(keys[3], 64, 2)
    p["bo"] = jnp.zeros((1, 2), jnp.float32)
    return p


def prepare_kernel_params(params):
    """Host-side preprocessing: fold LN affines into the next Linear and cast
    matmul weights to bf16. No feature/logit padding (see perf notes)."""
    def fold(gamma, beta, w, b):
        # (x_norm * g + bt) @ W + b == x_norm @ (g[:,None]*W) + (bt @ W + b)
        w_f = gamma.reshape(-1, 1) * w
        b_f = beta.reshape(1, -1) @ w + b
        return w_f, b_f

    w1f, b1f = fold(params["g0"], params["b0"], params["w1"], params["bb1"])
    w2f, b2f = fold(params["g1"], params["bt1"], params["w2"], params["bb2"])
    w3f, b3f = fold(params["g2"], params["bt2"], params["w3"], params["bb3"])
    wof, bof = fold(params["g3"], params["bt3"], params["wo"], params["bo"])

    bf16 = lambda a: a.astype(jnp.bfloat16)
    f32 = lambda a: a.astype(jnp.float32)
    return {
        "w1": bf16(w1f), "b1": f32(b1f),
        "w2": bf16(w2f), "b2": f32(b2f),
        "w3": bf16(w3f), "b3": f32(b3f),
        "wo": bf16(wof), "bo": f32(bof),
    }


def _choose_tiling(batch, tile_b_max):
    """Pick the grid-step count first, then derive tile_b (multiple of 8
    sublanes) so an awkward batch doesn't pad to ~2x its rows. Guarantee
    >= 2 parallel steps when the batch allows it (v7x has 2 TensorCores that
    are fed by sharding the parallel grid axis)."""
    b8 = _round_up(batch, 8)
    num_tiles = max(1, (b8 + tile_b_max - 1) // tile_b_max)
    if num_tiles < 2 and b8 >= 16:
        num_tiles = 2
    tile_b = _round_up((b8 + num_tiles - 1) // num_tiles, 8)
    b_pad = tile_b * num_tiles
    return tile_b, b_pad, num_tiles


def adultnet_forward(x, kparams, *, tile_b_max=1024):
    """x: [B, input_dim] float32. kparams: output of prepare_kernel_params.

    VMEM is nowhere near the limit here (even tile_b=2048 uses ~a few MiB of
    tiles/activations vs the 32 MiB scoped default), so tile_b_max is set for
    step-overhead amortization, not VMEM.
    """
    B, input_dim = x.shape
    tile_b, b_pad, num_tiles = _choose_tiling(B, tile_b_max)

    x_f32 = x.astype(jnp.float32)
    if b_pad != B:
        # Only the batch axis is ever padded (zero rows, sliced away below).
        x_f32 = jnp.pad(x_f32, ((0, b_pad - B), (0, 0)))

    args = (x_f32,
            kparams["w1"], kparams["b1"],
            kparams["w2"], kparams["b2"],
            kparams["w3"], kparams["b3"],
            kparams["wo"], kparams["bo"])

    # x: batch-tiled block; last dim equals the full array dim (legal even
    # though input_dim < 128). Weights/biases: full-array blocks with constant
    # index_maps -> resident in VMEM across all grid steps (no per-step DMA).
    in_specs = [pl.BlockSpec((tile_b, input_dim), lambda i: (i, 0))]
    in_specs += [pl.BlockSpec(a.shape, lambda i: (0, 0)) for a in args[1:]]

    out = pl.pallas_call(
        adultnet_kernel,
        out_shape=jax.ShapeDtypeStruct((b_pad, 2), jnp.float32),
        grid=(num_tiles,),
        in_specs=in_specs,
        out_specs=pl.BlockSpec((tile_b, 2), lambda i: (i, 0)),
        compiler_params=pltpu.CompilerParams(
            dimension_semantics=("parallel",)),
    )(*args)
    return out[:B]


def adultnet_reference(x, params):
    """Pure-JAX reference implementing the module semantics (eval mode), with
    the same bf16 matmul-operand quantization the kernel uses."""
    def ln(h, g, b):
        m = jnp.mean(h, axis=-1, keepdims=True)
        v = jnp.mean((h - m) ** 2, axis=-1, keepdims=True)
        return (h - m) * jax.lax.rsqrt(v + LN_EPS) * g + b

    def lin(h, w, b):
        return jnp.dot(h.astype(jnp.bfloat16), w.astype(jnp.bfloat16),
                       preferred_element_type=jnp.float32) + b

    h = ln(x.astype(jnp.float32), params["g0"], params["b0"])
    h = ln(jnp.maximum(lin(h, params["w1"], params["bb1"]), 0.0),
           params["g1"], params["bt1"])
    h = ln(jnp.maximum(lin(h, params["w2"], params["bb2"]), 0.0),
           params["g2"], params["bt2"])
    h = ln(jnp.maximum(lin(h, params["w3"], params["bb3"]), 0.0),
           params["g3"], params["bt3"])
    return lin(h, params["wo"], params["bo"])


if __name__ == "__main__":
    key = jax.random.PRNGKey(0)
    k_x, k_p = jax.random.split(key)

    batch, input_dim = 8, 32
    x = jax.random.normal(k_x, (batch, input_dim), dtype=jnp.float32)
    params = init_params(k_p, input_dim)
    kparams = prepare_kernel_params(params)

    out = adultnet_forward(x, kparams)
    out = jax.block_until_ready(out)

    ref = adultnet_reference(x, params)
    assert out.shape == (batch, 2), out.shape
    assert jnp.allclose(out, ref, atol=2e-3, rtol=2e-3), (out, ref)

    print("KERNEL_OK")
</pallas_src>

<mosaic_0001>
module attributes {stable_mosaic.version = 11 : i64} {
  func.func @adultnet_kernel(%arg0: i32, %arg1: memref<8x32xf32, #tpu.memory_space<vmem>>, %arg2: memref<32x256xbf16, #tpu.memory_space<vmem>>, %arg3: memref<1x256xf32, #tpu.memory_space<vmem>>, %arg4: memref<256x128xbf16, #tpu.memory_space<vmem>>, %arg5: memref<1x128xf32, #tpu.memory_space<vmem>>, %arg6: memref<128x64xbf16, #tpu.memory_space<vmem>>, %arg7: memref<1x64xf32, #tpu.memory_space<vmem>>, %arg8: memref<64x2xbf16, #tpu.memory_space<vmem>>, %arg9: memref<1x2xf32, #tpu.memory_space<vmem>>, %arg10: memref<8x2xf32, #tpu.memory_space<vmem>>) attributes {dimension_semantics = [#tpu.dimension_semantics<parallel>], iteration_bounds = array<i64: 1>, scalar_prefetch = 0 : i64, scratch_operands = 0 : i64, tpu.core_type = #tpu.core_type<tc>, window_params = [{transform_indices = @transform_0, window_bounds = array<i64: 8, 32>}, {pipeline_mode = #tpu.pipeline_mode<synchronous>, transform_indices = @transform_1, window_bounds = array<i64: 32, 256>}, {pipeline_mode = #tpu.pipeline_mode<synchronous>, transform_indices = @transform_2, window_bounds = array<i64: 1, 256>}, {pipeline_mode = #tpu.pipeline_mode<synchronous>, transform_indices = @transform_3, window_bounds = array<i64: 256, 128>}, {pipeline_mode = #tpu.pipeline_mode<synchronous>, transform_indices = @transform_4, window_bounds = array<i64: 1, 128>}, {pipeline_mode = #tpu.pipeline_mode<synchronous>, transform_indices = @transform_5, window_bounds = array<i64: 128, 64>}, {pipeline_mode = #tpu.pipeline_mode<synchronous>, transform_indices = @transform_6, window_bounds = array<i64: 1, 64>}, {pipeline_mode = #tpu.pipeline_mode<synchronous>, transform_indices = @transform_7, window_bounds = array<i64: 64, 2>}, {pipeline_mode = #tpu.pipeline_mode<synchronous>, transform_indices = @transform_8, window_bounds = array<i64: 1, 2>}, {transform_indices = @transform_9, window_bounds = array<i64: 8, 2>}]} {
    %c0 = arith.constant 0 : index
    %c0_0 = arith.constant 0 : index
    %0 = vector.load %arg1[%c0, %c0_0] : memref<8x32xf32, #tpu.memory_space<vmem>>, vector<8x32xf32>
    %cst = arith.constant dense<0.000000e+00> : vector<8xf32>
    %1 = vector.multi_reduction <add>, %0, %cst [1] : vector<8x32xf32> to vector<8xf32>
    %2 = vector.shape_cast %1 : vector<8xf32> to vector<8x1xf32>
    %cst_1 = arith.constant 3.200000e+01 : f32
    %3 = vector.broadcast %cst_1 : f32 to vector<8x1xf32>
    %4 = arith.divf %2, %3 : vector<8x1xf32>
    %5 = arith.mulf %0, %0 : vector<8x32xf32>
    %cst_2 = arith.constant dense<0.000000e+00> : vector<8xf32>
    %6 = vector.multi_reduction <add>, %5, %cst_2 [1] : vector<8x32xf32> to vector<8xf32>
    %7 = vector.shape_cast %6 : vector<8xf32> to vector<8x1xf32>
    %cst_3 = arith.constant 3.200000e+01 : f32
    %8 = vector.broadcast %cst_3 : f32 to vector<8x1xf32>
    %9 = arith.divf %7, %8 : vector<8x1xf32>
    %10 = arith.mulf %4, %4 : vector<8x1xf32>
    %11 = arith.subf %9, %10 : vector<8x1xf32>
    %cst_4 = arith.constant 0.000000e+00 : f32
    %12 = vector.broadcast %cst_4 : f32 to vector<8x1xf32>
    %13 = arith.maximumf %11, %12 : vector<8x1xf32>
    %14 = vector.broadcast %4 : vector<8x1xf32> to vector<8x32xf32>
    %15 = arith.subf %0, %14 : vector<8x32xf32>
    %cst_5 = arith.constant 9.99999974E-6 : f32
    %16 = vector.broadcast %cst_5 : f32 to vector<8x1xf32>
    %17 = arith.addf %13, %16 : vector<8x1xf32>
    %18 = math.rsqrt %17 : vector<8x1xf32>
    %19 = vector.broadcast %18 : vector<8x1xf32> to vector<8x32xf32>
    %20 = arith.mulf %15, %19 : vector<8x32xf32>
    %21 = arith.truncf %20 : vector<8x32xf32> to vector<8x32xbf16>
    %c0_6 = arith.constant 0 : index
    %c0_7 = arith.constant 0 : index
    %22 = vector.load %arg2[%c0_6, %c0_7] : memref<32x256xbf16, #tpu.memory_space<vmem>>, vector<32x256xbf16>
    %cst_8 = arith.constant dense<0.000000e+00> : vector<8x256xf32>
    %23 = tpu.matmul %21, %22, %cst_8 {dimension_numbers = #tpu.dot_dimension_numbers<[1], [0], [0], [1], [0, 0, 1, 1], [], []>} : vector<8x32xbf16>, vector<32x256xbf16>, vector<8x256xf32> -> vector<8x256xf32>
    %c0_9 = arith.constant 0 : index
    %c0_10 = arith.constant 0 : index
    %24 = vector.load %arg3[%c0_9, %c0_10] : memref<1x256xf32, #tpu.memory_space<vmem>>, vector<1x256xf32>
    %25 = vector.broadcast %24 : vector<1x256xf32> to vector<8x256xf32>
    %26 = arith.addf %23, %25 : vector<8x256xf32>
    %cst_11 = arith.constant 0.000000e+00 : f32
    %27 = vector.broadcast %cst_11 : f32 to vector<8x256xf32>
    %28 = arith.maximumf %26, %27 : vector<8x256xf32>
    %cst_12 = arith.constant dense<0.000000e+00> : vector<8xf32>
    %29 = vector.multi_reduction <add>, %28, %cst_12 [1] : vector<8x256xf32> to vector<8xf32>
    %30 = vector.shape_cast %29 : vector<8xf32> to vector<8x1xf32>
    %cst_13 = arith.constant 2.560000e+02 : f32
    %31 = vector.broadcast %cst_13 : f32 to vector<8x1xf32>
    %32 = arith.divf %30, %31 : vector<8x1xf32>
    %33 = arith.mulf %28, %28 : vector<8x256xf32>
    %cst_14 = arith.constant dense<0.000000e+00> : vector<8xf32>
    %34 = vector.multi_reduction <add>, %33, %cst_14 [1] : vector<8x256xf32> to vector<8xf32>
    %35 = vector.shape_cast %34 : vector<8xf32> to vector<8x1xf32>
    %cst_15 = arith.constant 2.560000e+02 : f32
    %36 = vector.broadcast %cst_15 : f32 to vector<8x1xf32>
    %37 = arith.divf %35, %36 : vector<8x1xf32>
    %38 = arith.mulf %32, %32 : vector<8x1xf32>
    %39 = arith.subf %37, %38 : vector<8x1xf32>
    %cst_16 = arith.constant 0.000000e+00 : f32
    %40 = vector.broadcast %cst_16 : f32 to vector<8x1xf32>
    %41 = arith.maximumf %39, %40 : vector<8x1xf32>
    %42 = vector.broadcast %32 : vector<8x1xf32> to vector<8x256xf32>
    %43 = arith.subf %28, %42 : vector<8x256xf32>
    %cst_17 = arith.constant 9.99999974E-6 : f32
    %44 = vector.broadcast %cst_17 : f32 to vector<8x1xf32>
    %45 = arith.addf %41, %44 : vector<8x1xf32>
    %46 = math.rsqrt %45 : vector<8x1xf32>
    %47 = vector.broadcast %46 : vector<8x1xf32> to vector<8x256xf32>
    %48 = arith.mulf %43, %47 : vector<8x256xf32>
    %49 = arith.truncf %48 : vector<8x256xf32> to vector<8x256xbf16>
    %c0_18 = arith.constant 0 : index
    %c0_19 = arith.constant 0 : index
    %50 = vector.load %arg4[%c0_18, %c0_19] : memref<256x128xbf16, #tpu.memory_space<vmem>>, vector<256x128xbf16>
    %cst_20 = arith.constant dense<0.000000e+00> : vector<8x128xf32>
    %51 = tpu.matmul %49, %50, %cst_20 {dimension_numbers = #tpu.dot_dimension_numbers<[1], [0], [0], [1], [0, 0, 1, 1], [], []>} : vector<8x256xbf16>, vector<256x128xbf16>, vector<8x128xf32> -> vector<8x128xf32>
    %c0_21 = arith.constant 0 : index
    %c0_22 = arith.constant 0 : index
    %52 = vector.load %arg5[%c0_21, %c0_22] : memref<1x128xf32, #tpu.memory_space<vmem>>, vector<1x128xf32>
    %53 = vector.broadcast %52 : vector<1x128xf32> to vector<8x128xf32>
    %54 = arith.addf %51, %53 : vector<8x128xf32>
    %cst_23 = arith.constant 0.000000e+00 : f32
    %55 = vector.broadcast %cst_23 : f32 to vector<8x128xf32>
    %56 = arith.maximumf %54, %55 : vector<8x128xf32>
    %cst_24 = arith.constant dense<0.000000e+00> : vector<8xf32>
    %57 = vector.multi_reduction <add>, %56, %cst_24 [1] : vector<8x128xf32> to vector<8xf32>
    %58 = vector.shape_cast %57 : vector<8xf32> to vector<8x1xf32>
    %cst_25 = arith.constant 1.280000e+02 : f32
    %59 = vector.broadcast %cst_25 : f32 to vector<8x1xf32>
    %60 = arith.divf %58, %59 : vector<8x1xf32>
    %61 = arith.mulf %56, %56 : vector<8x128xf32>
    %cst_26 = arith.constant dense<0.000000e+00> : vector<8xf32>
    %62 = vector.multi_reduction <add>, %61, %cst_26 [1] : vector<8x128xf32> to vector<8xf32>
    %63 = vector.shape_cast %62 : vector<8xf32> to vector<8x1xf32>
    %cst_27 = arith.constant 1.280000e+02 : f32
    %64 = vector.broadcast %cst_27 : f32 to vector<8x1xf32>
    %65 = arith.divf %63, %64 : vector<8x1xf32>
    %66 = arith.mulf %60, %60 : vector<8x1xf32>
    %67 = arith.subf %65, %66 : vector<8x1xf32>
    %cst_28 = arith.constant 0.000000e+00 : f32
    %68 = vector.broadcast %cst_28 : f32 to vector<8x1xf32>
    %69 = arith.maximumf %67, %68 : vector<8x1xf32>
    %70 = vector.broadcast %60 : vector<8x1xf32> to vector<8x128xf32>
    %71 = arith.subf %56, %70 : vector<8x128xf32>
    %cst_29 = arith.constant 9.99999974E-6 : f32
    %72 = vector.broadcast %cst_29 : f32 to vector<8x1xf32>
    %73 = arith.addf %69, %72 : vector<8x1xf32>
    %74 = math.rsqrt %73 : vector<8x1xf32>
    %75 = vector.broadcast %74 : vector<8x1xf32> to vector<8x128xf32>
    %76 = arith.mulf %71, %75 : vector<8x128xf32>
    %77 = arith.truncf %76 : vector<8x128xf32> to vector<8x128xbf16>
    %c0_30 = arith.constant 0 : index
    %c0_31 = arith.constant 0 : index
    %78 = vector.load %arg6[%c0_30, %c0_31] : memref<128x64xbf16, #tpu.memory_space<vmem>>, vector<128x64xbf16>
    %cst_32 = arith.constant dense<0.000000e+00> : vector<8x64xf32>
    %79 = tpu.matmul %77, %78, %cst_32 {dimension_numbers = #tpu.dot_dimension_numbers<[1], [0], [0], [1], [0, 0, 1, 1], [], []>} : vector<8x128xbf16>, vector<128x64xbf16>, vector<8x64xf32> -> vector<8x64xf32>
    %c0_33 = arith.constant 0 : index
    %c0_34 = arith.constant 0 : index
    %80 = vector.load %arg7[%c0_33, %c0_34] : memref<1x64xf32, #tpu.memory_space<vmem>>, vector<1x64xf32>
    %81 = vector.broadcast %80 : vector<1x64xf32> to vector<8x64xf32>
    %82 = arith.addf %79, %81 : vector<8x64xf32>
    %cst_35 = arith.constant 0.000000e+00 : f32
    %83 = vector.broadcast %cst_35 : f32 to vector<8x64xf32>
    %84 = arith.maximumf %82, %83 : vector<8x64xf32>
    %cst_36 = arith.constant dense<0.000000e+00> : vector<8xf32>
    %85 = vector.multi_reduction <add>, %84, %cst_36 [1] : vector<8x64xf32> to vector<8xf32>
    %86 = vector.shape_cast %85 : vector<8xf32> to vector<8x1xf32>
    %cst_37 = arith.constant 6.400000e+01 : f32
    %87 = vector.broadcast %cst_37 : f32 to vector<8x1xf32>
    %88 = arith.divf %86, %87 : vector<8x1xf32>
    %89 = arith.mulf %84, %84 : vector<8x64xf32>
    %cst_38 = arith.constant dense<0.000000e+00> : vector<8xf32>
    %90 = vector.multi_reduction <add>, %89, %cst_38 [1] : vector<8x64xf32> to vector<8xf32>
    %91 = vector.shape_cast %90 : vector<8xf32> to vector<8x1xf32>
    %cst_39 = arith.constant 6.400000e+01 : f32
    %92 = vector.broadcast %cst_39 : f32 to vector<8x1xf32>
    %93 = arith.divf %91, %92 : vector<8x1xf32>
    %94 = arith.mulf %88, %88 : vector<8x1xf32>
    %95 = arith.subf %93, %94 : vector<8x1xf32>
    %cst_40 = arith.constant 0.000000e+00 : f32
    %96 = vector.broadcast %cst_40 : f32 to vector<8x1xf32>
    %97 = arith.maximumf %95, %96 : vector<8x1xf32>
    %98 = vector.broadcast %88 : vector<8x1xf32> to vector<8x64xf32>
    %99 = arith.subf %84, %98 : vector<8x64xf32>
    %cst_41 = arith.constant 9.99999974E-6 : f32
    %100 = vector.broadcast %cst_41 : f32 to vector<8x1xf32>
    %101 = arith.addf %97, %100 : vector<8x1xf32>
    %102 = math.rsqrt %101 : vector<8x1xf32>
    %103 = vector.broadcast %102 : vector<8x1xf32> to vector<8x64xf32>
    %104 = arith.mulf %99, %103 : vector<8x64xf32>
    %105 = arith.truncf %104 : vector<8x64xf32> to vector<8x64xbf16>
    %c0_42 = arith.constant 0 : index
    %c0_43 = arith.constant 0 : index
    %106 = vector.load %arg8[%c0_42, %c0_43] : memref<64x2xbf16, #tpu.memory_space<vmem>>, vector<64x2xbf16>
    %cst_44 = arith.constant dense<0.000000e+00> : vector<8x2xf32>
    %107 = tpu.matmul %105, %106, %cst_44 {dimension_numbers = #tpu.dot_dimension_numbers<[1], [0], [0], [1], [0, 0, 1, 1], [], []>} : vector<8x64xbf16>, vector<64x2xbf16>, vector<8x2xf32> -> vector<8x2xf32>
    %c0_45 = arith.constant 0 : index
    %c0_46 = arith.constant 0 : index
    %108 = vector.load %arg9[%c0_45, %c0_46] : memref<1x2xf32, #tpu.memory_space<vmem>>, vector<1x2xf32>
    %109 = vector.broadcast %108 : vector<1x2xf32> to vector<8x2xf32>
    %110 = arith.addf %107, %109 : vector<8x2xf32>
    %c0_47 = arith.constant 0 : index
    %c0_48 = arith.constant 0 : index
    %111 = vector.load %arg10[%c0_47, %c0_48] : memref<8x2xf32, #tpu.memory_space<vmem>>, vector<8x2xf32>
    tpu.vector_store %arg10[%c0_47, %c0_48], %110 {strides = array<i32>} : memref<8x2xf32, #tpu.memory_space<vmem>>, vector<8x2xf32>,
    return
  }
  func.func @transform_0(%arg0: i32) -> (i32, i32) {
    %c0_i32 = arith.constant 0 : i32
    %c0_i32_0 = arith.constant 0 : i32
    return %arg0, %c0_i32 : i32, i32
  }
  func.func @transform_1(%arg0: i32) -> (i32, i32) {
    %c0_i32 = arith.constant 0 : i32
    %c0_i32_0 = arith.constant 0 : i32
    %c0_i32_1 = arith.constant 0 : i32
    return %c0_i32, %c0_i32_0 : i32, i32
  }
  func.func @transform_2(%arg0: i32) -> (i32, i32) {
    %c0_i32 = arith.constant 0 : i32
    %c0_i32_0 = arith.constant 0 : i32
    %c0_i32_1 = arith.constant 0 : i32
    return %c0_i32, %c0_i32_0 : i32, i32
  }
  func.func @transform_3(%arg0: i32) -> (i32, i32) {
    %c0_i32 = arith.constant 0 : i32
    %c0_i32_0 = arith.constant 0 : i32
    %c0_i32_1 = arith.constant 0 : i32
    return %c0_i32, %c0_i32_0 : i32, i32
  }
  func.func @transform_4(%arg0: i32) -> (i32, i32) {
    %c0_i32 = arith.constant 0 : i32
    %c0_i32_0 = arith.constant 0 : i32
    %c0_i32_1 = arith.constant 0 : i32
    return %c0_i32, %c0_i32_0 : i32, i32
  }
  func.func @transform_5(%arg0: i32) -> (i32, i32) {
    %c0_i32 = arith.constant 0 : i32
    %c0_i32_0 = arith.constant 0 : i32
    %c0_i32_1 = arith.constant 0 : i32
    return %c0_i32, %c0_i32_0 : i32, i32
  }
  func.func @transform_6(%arg0: i32) -> (i32, i32) {
    %c0_i32 = arith.constant 0 : i32
    %c0_i32_0 = arith.constant 0 : i32
    %c0_i32_1 = arith.constant 0 : i32
    return %c0_i32, %c0_i32_0 : i32, i32
  }
  func.func @transform_7(%arg0: i32) -> (i32, i32) {
    %c0_i32 = arith.constant 0 : i32
    %c0_i32_0 = arith.constant 0 : i32
    %c0_i32_1 = arith.constant 0 : i32
    return %c0_i32, %c0_i32_0 : i32, i32
  }
  func.func @transform_8(%arg0: i32) -> (i32, i32) {
    %c0_i32 = arith.constant 0 : i32
    %c0_i32_0 = arith.constant 0 : i32
    %c0_i32_1 = arith.constant 0 : i32
    return %c0_i32, %c0_i32_0 : i32, i32
  }
  func.func @transform_9(%arg0: i32) -> (i32, i32) {
    %c0_i32 = arith.constant 0 : i32
    %c0_i32_0 = arith.constant 0 : i32
    return %arg0, %c0_i32 : i32, i32
  }
}

</mosaic_0001>

<bundles_post_ra>
// kernel: tpu_custom_call.1
= control target key start
LH: loop header
LB: loop body
LE: loop exit
PB: predicated region body
PF: predicated region fallthrough
CT: control target
= control target key end

     0   :  { %14 = vsyncpa [#allocation3], 0  ;;  %s976_s0 = inlined_call_operand.hbm [shape: f32[8,32], index: 0, kind: input, shape index: {}]   ;;  %s977_s1 = inlined_call_operand.hbm [shape: bf16[32,256], index: 1, kind: input, shape index: {}]   ;;  %s978_s2 = inlined_call_operand.vmem [shape: f32[1,256], index: 2, kind: input, shape index: {}]   ;;  %s979_s3 = inlined_call_operand.vmem [shape: bf16[256,128], index: 3, kind: input, shape index: {}]   ;;  %s980_s4 = inlined_call_operand.vmem [shape: f32[1,128], index: 4, kind: input, shape index: {}]   ;;  %s981_s5 = inlined_call_operand.vmem [shape: bf16[128,64], index: 5, kind: input, shape index: {}]   ;;  %s982_s6 = inlined_call_operand.vmem [shape: f32[1,64], index: 6, kind: input, shape index: {}]   ;;  %s983_s7 = inlined_call_operand.vmem [shape: bf16[64,2], index: 7, kind: input, shape index: {}]   ;;  %s984_s8 = inlined_call_operand.vmem [shape: f32[1,2], index: 8, kind: input, shape index: {}]   ;;  %s985_s9 = inlined_call_operand.vmem [shape: f32[8,2], index: 9, kind: output, shape index: {}]  }
   0x1   :  { %15 = vsyncpa [#allocation5], 0  ;;  %s794_s30 = smov [#allocation2]   ;;  %s795_s11 = smov [#allocation4]  }
   0x2   :  { %s22_s10 = sshll.u32 %s794_s30, 4  ;;  %s31_s12 = sshll.u32 %s795_s11, 4  ;;  %s23_s10 = int_to_ptr.vmem [resolvable:$true] %s22_s10  ;;  %s32_s12 = int_to_ptr.vmem [resolvable:$true] %s31_s12 }
   0x3   :  { %s758_s13 = scalar_lea.vmem %s23_s10, 128  ;;  %p763_p1 = scmp.lt.s32.totalorder %s23_s10, %s23_s10 }
   0x4   :  { %p759_p0 = scmp.ne.s32.totalorder %s23_s10, %s758_s13  ;;  %p764_p2 = scmp.lt.s32.totalorder %s758_s13, %s758_s13 }
   0x6   :  { %p765_p3 = por %p764_p2, %p763_p1 }
   0x8   :  { %p766_p4 = pnand %p765_p3, %p759_p0 }
   0xa   :  { %769 = shalt.err (!%p766_p4)
}
   0xb   :  { %25 = dma.hbm_to_vmem [thread:$0]  %s976_s0, 128, %s23_s10, [#allocation3]  }
   0xc   :  { %s778_s16 = scalar_lea.vmem %s32_s12, 512  ;;  %p783_p6 = scmp.lt.s32.totalorder %s32_s12, %s32_s12 }
   0xd   :  { %p779_p5 = scmp.ne.s32.totalorder %s32_s12, %s778_s16  ;;  %p784_p7 = scmp.lt.s32.totalorder %s778_s16, %s778_s16 }
   0xf   :  { %p785_p8 = por %p784_p7, %p783_p6 }
  0x11   :  { %p786_p9 = pnand %p785_p8, %p779_p5 }
  0x13   :  { %789 = shalt.err (!%p786_p9)
}
  0x14   :  { %s796_s17 = smov 128   ;;  %s797_s18 = smov 8  }
  0x15   :  { %37 = dma.hbm_to_vmem [thread:$0]  %s977_s1, 512, %s32_s12, [#allocation5], %s796_s17, %s796_s17, %s797_s18  }
  0x16   :  { %790 = dma.done.wait [#allocation3], 128  }
  0x17   :  { %791 = vsyncadd [#allocation3], 4294967168 }
  0x18   :  { %792 = dma.done.wait [#allocation5], 512  }
  0x19   :  { %793 = vsyncadd [#allocation5], 4294966784  ;;  %vm60_vm0 = vcmask 261120   ;;  %v59_v0 = vld [vmem:[#allocation2] sm:$0xff]  ;;  %v711_v6 = vld [vmem:[#allocation4 + $0x4] ss:$8 sps:$4 sm:$0xff]   ;;  %v85_v22 = vlaneseq }
  0x1a   :  { %v61_v1 = vsel %vm60_vm0, %v59_v0, 0.0  ;;  %v66_v2 = vmul.f32 %v59_v0, %v59_v0  ;;  %v708_v4 = vld [vmem:[#allocation4 + $0x14] ss:$8 sps:$4 sm:$0xff]   ;;  %v710_v5 = vld [vmem:[#allocation4 + $0x10] ss:$8 sps:$4 sm:$0xff]   ;;  %v798_v7 = vmov 0  }
  0x1b   :  { %62 = vadd.xlane.f32.xlu0 %v61_v1  ;;  %130 = vmatprep.subr.bf16.mxu0 %v708_v4  ;;  %v713_v8 = vld [vmem:[#allocation4] ss:$8 sps:$4 sm:$0xff]   ;;  %v714_v21 = vld [vmem:[%s979_s3 + $0x78] sm:$0xff]   ;;  %v86_v23 = vshrl.u32 %v85_v22, 7  ;;  %v83_v25 = vld [vmem:[%s978_s2] sm:$0x3] }
  0x1c   :  { %v67_v3 = vsel %vm60_vm0, %v66_v2, 0.0  ;;  %150 = vmatprep.mubr.bf16.mxu0 %v798_v7  ;;  %131 = vmatpush1.bf16.msra.mxu0 %v710_v5  ;;  %v715_v41 = vld [vmem:[%s979_s3 + $0x38] sm:$0xff]   ;;  %v716_v42 = vld [vmem:[%s979_s3 + $0x70] sm:$0xff]   ;;  %v718_v44 = vld [vmem:[%s979_s3 + $0x68] sm:$0xff]   ;;  %vm800_vm1 = vmmov 0   ;;  %vm487_vm2 = vcmask 523264  }
  0x1d   :  { %132 = vmatprep.subr.bf16.mxu0 %v711_v6  ;;  %633 = vmatprep.subr.bf16.mxu1 %v714_v21  ;;  %v87_v24 = vsub.s32 0, %v86_v23  ;;  %v91_v26 = vsub.s32 1, %v86_v23  ;;  %v717_v43 = vld [vmem:[%s979_s3 + $0x30] sm:$0xff]   ;;  %v719_v45 = vld [vmem:[%s979_s3 + $0x28] sm:$0xff]   ;;  %v720_v46 = vld [vmem:[%s979_s3 + $0x60] sm:$0xff]   ;;  %vm588_vm3 = vcmask 15360  }
  0x1e   :  { %634 = vmatpush3.bf16.msra.mxu1 %v715_v41  ;;  %v721_v47 = vld [vmem:[%s979_s3 + $0x20] sm:$0xff]   ;;  %v722_v48 = vld [vmem:[%s979_s3 + $0x58] sm:$0xff]   ;;  %v724_v50 = vld [vmem:[%s979_s3 + $0x50] sm:$0xff]  }
  0x1f   :  { %68 = vadd.xlane.f32.xlu0 %v67_v3  ;;  %v88_v27 = vrot.slane %v83_v25, %v87_v24  ;;  %v92_v28 = vrot.slane %v83_v25, %v91_v26  ;;  %635 = vmatprep.subr.bf16.mxu1 %v716_v42  ;;  %v723_v49 = vld [vmem:[%s979_s3 + $0x18] sm:$0xff]   ;;  %v725_v51 = vld [vmem:[%s979_s3 + $0x10] sm:$0xff]   ;;  %v726_v52 = vld [vmem:[%s979_s3 + $0x48] sm:$0xff]  }
  0x20   :  { %133 = vmatpush1.bf16.msra.mxu0 %v713_v8  ;;  %v727_v53 = vld [vmem:[%s979_s3 + $0x8] sm:$0xff]   ;;  %v728_v54 = vld [vmem:[%s979_s3 + $0x40] sm:$0xff]   ;;  %v730_v7 = vld [vmem:[%s981_s5 + $0x38] sm:$0xff]   ;;  %v799_v8 = vmov 0.0  }
  0x21   :  { %v729_v55 = vld [vmem:[%s979_s3] sm:$0xff]   ;;  %669 = vmatprep.subr.bf16.mxu0 %v799_v8  ;;  %v734_v21 = vld [vmem:[%s981_s5 + $0x18] sm:$0xff]   ;;  %v735_v22 = vld [vmem:[%s981_s5 + $0x10] sm:$0xff]  }
  0x22   :  { %636 = vmatpush3.bf16.msra.mxu1 %v717_v43  ;;  %v736_v23 = vld [vmem:[%s981_s5 + $0x8] sm:$0xff]   ;;  %v737_v24 = vld [vmem:[%s981_s5] sm:$0xff]  }
  0x23   :  { %637 = vmatprep.subr.bf16.mxu1 %v718_v44 }
  0x26   :  { %638 = vmatpush3.bf16.msra.mxu1 %v719_v45 }
  0x27   :  { %639 = vmatprep.subr.bf16.mxu1 %v720_v46 }
  0x2a   :  { %640 = vmatpush3.bf16.msra.mxu1 %v721_v47  ;;  %v738_v47 = vld [vmem:[%s983_s7 + $0x18] sm:$0xff]  }
  0x2b   :  { %641 = vmatprep.subr.bf16.mxu1 %v722_v48  ;;  %v739_v48 = vld [vmem:[%s983_s7 + $0x10] sm:$0xff]  }
  0x2e   :  { %642 = vmatpush3.bf16.msra.mxu1 %v723_v49  ;;  %v740_v49 = vld [vmem:[%s983_s7 + $0x8] sm:$0xff]  }
  0x2f   :  { %643 = vmatprep.subr.bf16.mxu1 %v724_v50  ;;  %v741_v50 = vld [vmem:[%s983_s7] sm:$0xff]  }
  0x32   :  { %644 = vmatpush3.bf16.msra.mxu1 %v725_v51 }
  0x33   :  { %645 = vmatprep.subr.bf16.mxu1 %v726_v52 }
  0x36   :  { %646 = vmatpush3.bf16.msra.mxu1 %v727_v53 }
  0x37   :  { %647 = vmatprep.subr.bf16.mxu1 %v728_v54 }
  0x3a   :  { %648 = vmatpush3.bf16.msra.mxu1 %v729_v55 }
  0x3b   :  { %689 = vmatprep.subr.bf16.mxu1 %v799_v8 }
  0xa4   :  { %v63_v9 = vpop.xlane.xlu0 %62 }
  0xa5   :  { %v65_v10 = vmul.f32 0.03125, %v63_v9 }
  0xa7   :  { %v71_v12 = vmul.f32 %v65_v10, %v65_v10  ;;  %v74_v17 = vsub.f32 %v59_v0, %v65_v10  ;;  %v601_v10 = vld [vmem:[%s980_s4] ss:$0 sm:$0xff] }
  0xa8   :  { %v69_v11 = vpop.xlane.xlu0 %68 }
  0xa9   :  { %v70_v13 = vmul.f32 0.03125, %v69_v11 }
  0xab   :  { %v72_v14 = vsub.f32 %v70_v13, %v71_v12 }
  0xad   :  { %v73_v15 = vmax.f32 %v72_v14, 0.0 }
  0xaf   :  { %v75_v16 = vadd.f32 1e-05, %v73_v15 }
  0xb1   :  { %742 = vrsqrt.f32 %v75_v16 }
  0xbe   :  { %v743_v18 = vpop.eup %742 }
  0xbf   :  { %v77_v19 = vmul.f32 %v743_v18, %v74_v17  ;;  %v731_v18 = vld [vmem:[%s981_s5 + $0x30] sm:$0xff]  }
  0xc1   :  { %v78_v20 = vpack.c.bf16 %v77_v19, %v77_v19  ;;  %v732_v19 = vld [vmem:[%s981_s5 + $0x28] sm:$0xff]  }
  0xc3   :  { %600 = vmatmul.mubr.msk.bf16.vlgmr.msra.gmra.mxu0 %vm60_vm0, %v78_v20  ;;  %v733_v20 = vld [vmem:[%s981_s5 + $0x20] sm:$0xff]  }
  0xc4   :  { %670 = vmatpush3.bf16.msra.mxu0 %v730_v7  ;;  %685 = vmatprep.mubr.msk.bf16.mxu0 %vm800_vm1, %v799_v8 }
  0xc5   :  { %671 = vmatprep.subr.bf16.mxu0 %v799_v8 }
  0xc8   :  { %672 = vmatpush3.bf16.msra.mxu0 %v731_v18 }
  0xc9   :  { %673 = vmatprep.subr.bf16.mxu0 %v799_v8 }
  0xcc   :  { %674 = vmatpush3.bf16.msra.mxu0 %v732_v19 }
  0xcd   :  { %675 = vmatprep.subr.bf16.mxu0 %v799_v8 }
  0xd0   :  { %676 = vmatpush3.bf16.msra.mxu0 %v733_v20 }
  0xd1   :  { %677 = vmatprep.subr.bf16.mxu0 %v799_v8 }
  0xd4   :  { %678 = vmatpush3.bf16.msra.mxu0 %v734_v21 }
  0xd5   :  { %679 = vmatprep.subr.bf16.mxu0 %v799_v8 }
  0xd8   :  { %680 = vmatpush3.bf16.msra.mxu0 %v735_v22 }
  0xd9   :  { %681 = vmatprep.subr.bf16.mxu0 %v799_v8 }
  0xdc   :  { %682 = vmatpush3.bf16.msra.mxu0 %v736_v23 }
  0xdd   :  { %683 = vmatprep.subr.bf16.mxu0 %v799_v8 }
  0xe0   :  { %684 = vmatpush3.bf16.msra.mxu0 %v737_v24 }
 0x183   :  { %v152_v29 = vpop.f32.mrf.mxu0 }
 0x184   :  { %v153_v30 = vadd.f32 %v152_v29, %v88_v27 }
 0x185   :  { %v154_v31 = vpop.f32.mrf.mxu0 }
 0x186   :  { %v155_v32 = vadd.f32 %v154_v31, %v92_v28  ;;  %v159_v34 = vmax.f32 %v153_v30, 0.0 }
 0x187   :  { %v156_v33 = vpop.f32.mrf.mxu0 }
 0x188   :  { %v160_v35 = vmax.f32 %v155_v32, 0.0  ;;  %v166_v39 = vmul.f32 %v159_v34, %v159_v34 }
 0x189   :  { %v157_v36 = vpop.f32.mrf.mxu0 }
 0x18a   :  { %v161_v37 = vadd.f32 %v160_v35, %v159_v34  ;;  %v167_v38 = vmul.f32 %v160_v35, %v160_v35 }
 0x18c   :  { %162 = vadd.xlane.f32.xlu1 %v161_v37  ;;  %v168_v40 = vadd.f32 %v167_v38, %v166_v39  ;;  %v618_v37 = vld [vmem:[%s982_s6] ss:$0 sm:$0xff] }
 0x190   :  { %169 = vadd.xlane.f32.xlu1 %v168_v40 }
 0x215   :  { %v163_v56 = vpop.xlane.xlu1 %162 }
 0x216   :  { %v165_v57 = vmul.f32 0.00390625, %v163_v56 }
 0x218   :  { %v172_v59 = vmul.f32 %v165_v57, %v165_v57  ;;  %v175_v0 = vsub.f32 %v159_v34, %v165_v57  ;;  %v176_v1 = vsub.f32 %v160_v35, %v165_v57 }
 0x219   :  { %v170_v58 = vpop.xlane.xlu1 %169 }
 0x21a   :  { %v171_v60 = vmul.f32 0.00390625, %v170_v58 }
 0x21c   :  { %v173_v61 = vsub.f32 %v171_v60, %v172_v59 }
 0x21e   :  { %v174_v62 = vmax.f32 %v173_v61, 0.0 }
 0x220   :  { %v177_v63 = vadd.f32 1e-05, %v174_v62 }
 0x222   :  { %744 = vrsqrt.f32 %v177_v63  ;;  %v627_v63 = vld [vmem:[%s984_s8] ss:$0 sm:$0xff] }
 0x22f   :  { %v745_v2 = vpop.eup %744 }
 0x230   :  { %v180_v3 = vmul.f32 %v745_v2, %v176_v1  ;;  %v179_v4 = vmul.f32 %v745_v2, %v175_v0 }
 0x232   :  { %v182_v5 = vpack.c.bf16 %v180_v3, %v180_v3  ;;  %v181_v6 = vpack.c.bf16 %v179_v4, %v179_v4 }
 0x234   :  { %350 = vmatprep.mubr.bf16.mxu1 %v182_v5 }
 0x235   :  { %351 = vmatmul.mubr.bf16.vlgmr.msra.gmra.mxu1 %v181_v6 }
 0x236   :  { %697 = vmatprep.mubr.msk.bf16.mxu1 %vm800_vm1, %v799_v8  ;;  %690 = vmatpush3.bf16.msra.mxu1 %v738_v47 }
 0x237   :  { %691 = vmatprep.subr.bf16.mxu1 %v799_v8 }
 0x23a   :  { %692 = vmatpush3.bf16.msra.mxu1 %v739_v48 }
 0x23b   :  { %693 = vmatprep.subr.bf16.mxu1 %v799_v8 }
 0x23e   :  { %694 = vmatpush3.bf16.msra.mxu1 %v740_v49 }
 0x23f   :  { %695 = vmatprep.subr.bf16.mxu1 %v799_v8 }
 0x242   :  { %696 = vmatpush3.bf16.msra.mxu1 %v741_v50 }
 0x2f5   :  { %v649_v9 = vpop.f32.mrf.mxu1 }
 0x2f7   :  { %v650_v11 = vpop.f32.mrf.mxu1 }
 0x2f8   :  { %v651_v12 = vadd.f32 %v650_v11, %v649_v9 }
 0x2f9   :  { %v652_v13 = vpop.f32.mrf.mxu1 }
 0x2fa   :  { %v353_v14 = vadd.f32 %v651_v12, %v601_v10 }
 0x2fb   :  { %v653_v15 = vpop.f32.mrf.mxu1 }
 0x2fc   :  { %v358_v16 = vmax.f32 %v353_v14, 0.0 }
 0x2fe   :  { %359 = vadd.xlane.f32.xlu0 %v358_v16  ;;  %v363_v17 = vmul.f32 %v358_v16, %v358_v16 }
 0x300   :  { %364 = vadd.xlane.f32.xlu1 %v363_v17 }
 0x387   :  { %v360_v25 = vpop.xlane.xlu0 %359 }
 0x388   :  { %v362_v26 = vmul.f32 0.0078125, %v360_v25 }
 0x389   :  { %v365_v27 = vpop.xlane.xlu1 %364 }
 0x38a   :  { %v367_v28 = vmul.f32 %v362_v26, %v362_v26  ;;  %v366_v29 = vmul.f32 0.0078125, %v365_v27  ;;  %v370_v33 = vsub.f32 %v358_v16, %v362_v26 }
 0x38c   :  { %v368_v30 = vsub.f32 %v366_v29, %v367_v28 }
 0x38e   :  { %v369_v31 = vmax.f32 %v368_v30, 0.0 }
 0x390   :  { %v371_v32 = vadd.f32 1e-05, %v369_v31 }
 0x392   :  { %746 = vrsqrt.f32 %v371_v32 }
 0x39f   :  { %v747_v34 = vpop.eup %746 }
 0x3a0   :  { %v373_v35 = vmul.f32 %v747_v34, %v370_v33 }
 0x3a2   :  { %v374_v36 = vpack.c.bf16 %v373_v35, %v373_v35 }
 0x3a4   :  { %686 = vmatmul.mubr.bf16.vlgmr.msra.gmra.mxu0 %v374_v36 }
 0x464   :  { %v480_v38 = vpop.f32.mrf.mxu0 }
 0x465   :  { %v481_v39 = vadd.f32 %v618_v37, %v480_v38 }
 0x466   :  { %v687_v40 = vpop.f32.mrf.mxu0 }
 0x467   :  { %v486_v41 = vmax.f32 %v481_v39, 0.0 }
 0x468   :  { %v483_v42 = vpop.f32.mrf.mxu0 }
 0x469   :  { %v488_v43 = vsel %vm487_vm2, %v486_v41, 0.0  ;;  %v493_v44 = vmul.f32 %v486_v41, %v486_v41 }
 0x46a   :  { %489 = vadd.xlane.f32.xlu0 %v488_v43  ;;  %v688_v45 = vpop.f32.mrf.mxu0 }
 0x46b   :  { %v494_v46 = vsel %vm487_vm2, %v493_v44, 0.0 }
 0x46c   :  { %495 = vadd.xlane.f32.xlu1 %v494_v46 }
 0x4f3   :  { %v490_v51 = vpop.xlane.xlu0 %489 }
 0x4f4   :  { %v492_v52 = vmul.f32 0.015625, %v490_v51 }
 0x4f5   :  { %v496_v53 = vpop.xlane.xlu1 %495 }
 0x4f6   :  { %v498_v54 = vmul.f32 %v492_v52, %v492_v52  ;;  %v497_v55 = vmul.f32 0.015625, %v496_v53  ;;  %v501_v59 = vsub.f32 %v486_v41, %v492_v52 }
 0x4f8   :  { %v499_v56 = vsub.f32 %v497_v55, %v498_v54 }
 0x4fa   :  { %v500_v57 = vmax.f32 %v499_v56, 0.0 }
 0x4fc   :  { %v502_v58 = vadd.f32 1e-05, %v500_v57 }
 0x4fe   :  { %748 = vrsqrt.f32 %v502_v58 }
 0x50b   :  { %v749_v60 = vpop.eup %748 }
 0x50c   :  { %v504_v61 = vmul.f32 %v749_v60, %v501_v59 }
 0x50e   :  { %v505_v62 = vpack.c.bf16 %v504_v61, %v504_v61 }
 0x510   :  { %698 = vmatmul.mubr.msk.bf16.vlgmr.msra.gmra.mxu1 %vm487_vm2, %v505_v62 }
 0x5d0   :  { %v582_v0 = vpop.f32.mrf.mxu1 }
 0x5d1   :  { %v583_v1 = vadd.f32 %v627_v63, %v582_v0 }
 0x5d2   :  { %v699_v2 = vpop.f32.mrf.mxu1 }
 0x5d3   :  { %589 = vst.msk [vmem:[%s985_s9] sm:$0xff] %vm588_vm3, %v583_v1 }
 0x5d4   :  { %v585_v3 = vpop.f32.mrf.mxu1 }
 0x5d6   :  { %v700_v4 = vpop.f32.mrf.mxu1 }
 0x5d7   :  { %594 = vsyncpa [#allocation3], 1 }
 0x5d8   :  { %595 = vsyncpa [#allocation5], 1 }

</bundles_post_ra>
